<compile_context>
chip_gen: v7x
topology: tpu7x:2x2x1
jax: 0.10.0
libtpu: 0.0.40
codegen_flags: <defaults>
</compile_context>

<pallas_src>
import functools

import jax
import jax.numpy as jnp
import numpy as np
from jax.experimental import pallas as pl
from jax.experimental.pallas import tpu as pltpu


def _round_up(x, m):
    return (x + m - 1) // m * m


def adapter_kernel(x_ref, g_ref, b_ref, wdt_ref, bd_ref, wut_ref, bu_ref, o_ref,
                   *, eps, mm_dtype):
    f32 = jnp.float32

    # ---- LayerNorm over the feature (lane) dim, math in f32 ----
    x = x_ref[...].astype(f32)                       # (bt, D)
    mu = jnp.mean(x, axis=-1, keepdims=True)
    xc = x - mu
    var = jnp.mean(xc * xc, axis=-1, keepdims=True)
    inv = jax.lax.rsqrt(var + eps)
    h = (xc * inv * g_ref[...] + b_ref[...]).astype(mm_dtype)

    # ---- down_proj -> ReLU (MXU, f32 accumulation) ----
    down = jnp.dot(h, wdt_ref[...], preferred_element_type=f32)
    down = jnp.maximum(down + bd_ref[...], 0.0).astype(mm_dtype)

    # TODO(synk): dropout with p>0 in training mode not implemented (p=0.0 / eval => identity).

    # ---- up_proj (scale folded into weights/bias) + residual ----
    up = jnp.dot(down, wut_ref[...], preferred_element_type=f32)
    # Re-read the input tile for the residual so the f32 copy of x is not
    # live across both matmuls (smaller VMEM/vreg footprint).
    o_ref[...] = (up + bu_ref[...] + x_ref[...].astype(f32)).astype(o_ref.dtype)


def adapter_forward(x, ln_gamma, ln_beta, down_w, down_b, up_w, up_b,
                    *, scale=1.0, eps=1e-5, block_tokens=1024):
    """x: (B, S, D).  down_w: (db, D), up_w: (D, db) -- PyTorch Linear layout.

    Returns (B, S, D) in x.dtype.  Implements Adapter.forward with
    adapter_layernorm_option='in', add_residual=True, dropout as identity.
    """
    orig_dtype = x.dtype
    B, S, D = x.shape
    db = down_w.shape[0]
    T = B * S
    x2 = x.reshape(T, D)

    # MXU operand dtype: bf16 when the model is bf16, else keep f32.
    mm_dtype = jnp.bfloat16 if orig_dtype == jnp.bfloat16 else jnp.float32
    io_bytes = jnp.dtype(orig_dtype).itemsize
    mm_bytes = jnp.dtype(mm_dtype).itemsize

    # --- Parameter prep (tiny tensors, done once in the wrapper) ---
    # Pad the bottleneck to a lane-dense multiple of 128 with zeros
    # (ReLU(0 + 0) = 0 => no numeric effect).
    db_p = _round_up(db, 128)
    wd_t = jnp.asarray(down_w, jnp.float32).T                    # (D, db)
    bd2 = jnp.asarray(down_b, jnp.float32).reshape(1, db)        # (1, db)
    wu_t = (jnp.asarray(up_w, jnp.float32) * scale).T            # (db, D)
    bu2 = (jnp.asarray(up_b, jnp.float32) * scale).reshape(1, D)  # (1, D)
    if db_p != db:
        wd_t = jnp.pad(wd_t, ((0, 0), (0, db_p - db)))
        bd2 = jnp.pad(bd2, ((0, 0), (0, db_p - db)))
        wu_t = jnp.pad(wu_t, ((0, db_p - db), (0, 0)))
    wd_t = wd_t.astype(mm_dtype)                                  # (D, db_p)
    wu_t = wu_t.astype(mm_dtype)                                  # (db_p, D)
    g2 = jnp.asarray(ln_gamma, jnp.float32).reshape(1, D)
    b2 = jnp.asarray(ln_beta, jnp.float32).reshape(1, D)

    # --- Token tiling (VMEM-budgeted, v7x-safe; >=2 blocks when possible) ---
    # Per-token VMEM: double-buffered in+out io-dtype tiles + ~3 f32-wide
    # temporaries + the (bt, db_p) bottleneck intermediate.
    per_token = D * (4 * io_bytes + 3 * 4) + db_p * (4 + mm_bytes)
    vmem_budget = 32 << 20                      # fits v7x's 64 MiB comfortably
    if T <= 8:
        bt = T                                  # single full-extent block
    else:
        cap = max(8, (vmem_budget // per_token) // 8 * 8)
        # Guarantee >= 2 grid blocks so both v7x TensorCores get work.
        half = _round_up(pl.cdiv(T, 2), 8)
        bt = max(8, min(block_tokens, cap, half))

    grid = (pl.cdiv(T, bt),)

    est_vmem = bt * per_token + 2 * (wd_t.size + wu_t.size) * mm_bytes + (1 << 20)
    vmem_limit = int(min(64 << 20, max(32 << 20, int(est_vmem * 1.5))))

    kernel = functools.partial(adapter_kernel, eps=float(eps), mm_dtype=mm_dtype)

    out = pl.pallas_call(
        kernel,
        out_shape=jax.ShapeDtypeStruct((T, D), orig_dtype),
        grid=grid,
        in_specs=[
            pl.BlockSpec((bt, D), lambda i: (i, 0)),      # x tokens
            pl.BlockSpec((1, D), lambda i: (0, 0)),       # ln gamma (f32)
            pl.BlockSpec((1, D), lambda i: (0, 0)),       # ln beta (f32)
            pl.BlockSpec((D, db_p), lambda i: (0, 0)),    # down W^T (mm dtype)
            pl.BlockSpec((1, db_p), lambda i: (0, 0)),    # down bias (f32)
            pl.BlockSpec((db_p, D), lambda i: (0, 0)),    # up W^T (scaled, mm dtype)
            pl.BlockSpec((1, D), lambda i: (0, 0)),       # up bias (scaled, f32)
        ],
        out_specs=pl.BlockSpec((bt, D), lambda i: (i, 0)),
        compiler_params=pltpu.CompilerParams(
            dimension_semantics=("parallel",),
            vmem_limit_bytes=vmem_limit),
    )(x2, g2, b2, wd_t, bd2, wu_t, bu2)

    return out.reshape(B, S, D)


def reference(x, ln_gamma, ln_beta, down_w, down_b, up_w, up_b,
              *, scale=1.0, eps=1e-5):
    """Pure-JAX reference matching the PyTorch Adapter.forward semantics."""
    xf = x.astype(jnp.float32)
    mu = jnp.mean(xf, axis=-1, keepdims=True)
    var = jnp.mean((xf - mu) ** 2, axis=-1, keepdims=True)
    h = (xf - mu) / jnp.sqrt(var + eps) * ln_gamma + ln_beta
    down = jnp.maximum(h @ down_w.T + down_b, 0.0)
    up = (down @ up_w.T + up_b) * scale
    return (up + xf).astype(x.dtype)


if __name__ == "__main__":
    key = jax.random.PRNGKey(0)
    B, S, D, DB = 2, 8, 32, 8          # batch=2, seq=8, d_model=32, bottleneck=8
    ks = jax.random.split(key, 8)

    x = jax.random.normal(ks[0], (B, S, D), jnp.float32)
    ln_gamma = 1.0 + 0.1 * jax.random.normal(ks[1], (D,), jnp.float32)
    ln_beta = 0.1 * jax.random.normal(ks[2], (D,), jnp.float32)
    # down_proj: Linear(D -> DB); up_proj: Linear(DB -> D)  (PyTorch weight layout)
    down_w = jax.random.normal(ks[3], (DB, D), jnp.float32) * 0.3
    down_b = jax.random.normal(ks[4], (DB,), jnp.float32) * 0.1
    up_w = jax.random.normal(ks[5], (D, DB), jnp.float32) * 0.3
    up_b = jax.random.normal(ks[6], (D,), jnp.float32) * 0.1
    scale = 1.0                        # adapter_scalar='1.0'

    params = (ln_gamma, ln_beta, down_w, down_b, up_w, up_b)

    # f32 path (16 tokens -> two 8-row blocks, both TensorCores busy on v7x).
    out = jax.block_until_ready(adapter_forward(x, *params, scale=scale))
    ref = jax.block_until_ready(reference(x, *params, scale=scale))
    np.testing.assert_allclose(np.asarray(out), np.asarray(ref),
                               rtol=1e-4, atol=1e-4)

    # Ragged token count (T=15, not a multiple of the 8-row tile) exercises the
    # no-pad path with a masked partial last block.
    x_rag = jax.random.normal(ks[7], (3, 5, D), jnp.float32)
    out_rag = jax.block_until_ready(adapter_forward(x_rag, *params, scale=scale))
    ref_rag = jax.block_until_ready(reference(x_rag, *params, scale=scale))
    np.testing.assert_allclose(np.asarray(out_rag), np.asarray(ref_rag),
                               rtol=1e-4, atol=1e-4)

    # bf16 path feeds the MXU bf16 operands (f32 accumulation).
    xb = x.astype(jnp.bfloat16)
    out_b = jax.block_until_ready(adapter_forward(xb, *params, scale=scale))
    ref_b = jax.block_until_ready(reference(xb, *params, scale=scale))
    np.testing.assert_allclose(np.asarray(out_b, dtype=np.float32),
                               np.asarray(ref_b, dtype=np.float32),
                               rtol=0.1, atol=0.1)

    print("KERNEL_OK")
</pallas_src>

<mosaic_0001>
module attributes {stable_mosaic.version = 11 : i64} {
  func.func @adapter_kernel(%arg0: i32, %arg1: memref<8x32xf32, #tpu.memory_space<vmem>>, %arg2: memref<1x32xf32, #tpu.memory_space<vmem>>, %arg3: memref<1x32xf32, #tpu.memory_space<vmem>>, %arg4: memref<32x128xf32, #tpu.memory_space<vmem>>, %arg5: memref<1x128xf32, #tpu.memory_space<vmem>>, %arg6: memref<128x32xf32, #tpu.memory_space<vmem>>, %arg7: memref<1x32xf32, #tpu.memory_space<vmem>>, %arg8: memref<8x32xf32, #tpu.memory_space<vmem>>) attributes {dimension_semantics = [#tpu.dimension_semantics<parallel>], iteration_bounds = array<i64: 2>, scalar_prefetch = 0 : i64, scratch_operands = 0 : i64, tpu.core_type = #tpu.core_type<tc>, window_params = [{transform_indices = @transform_0, window_bounds = array<i64: 8, 32>}, {pipeline_mode = #tpu.pipeline_mode<synchronous>, transform_indices = @transform_1, window_bounds = array<i64: 1, 32>}, {pipeline_mode = #tpu.pipeline_mode<synchronous>, transform_indices = @transform_2, window_bounds = array<i64: 1, 32>}, {pipeline_mode = #tpu.pipeline_mode<synchronous>, transform_indices = @transform_3, window_bounds = array<i64: 32, 128>}, {pipeline_mode = #tpu.pipeline_mode<synchronous>, transform_indices = @transform_4, window_bounds = array<i64: 1, 128>}, {pipeline_mode = #tpu.pipeline_mode<synchronous>, transform_indices = @transform_5, window_bounds = array<i64: 128, 32>}, {pipeline_mode = #tpu.pipeline_mode<synchronous>, transform_indices = @transform_6, window_bounds = array<i64: 1, 32>}, {transform_indices = @transform_7, window_bounds = array<i64: 8, 32>}]} {
    %c0 = arith.constant 0 : index
    %c0_0 = arith.constant 0 : index
    %0 = vector.load %arg1[%c0, %c0_0] : memref<8x32xf32, #tpu.memory_space<vmem>>, vector<8x32xf32>
    %cst = arith.constant dense<0.000000e+00> : vector<8xf32>
    %1 = vector.multi_reduction <add>, %0, %cst [1] : vector<8x32xf32> to vector<8xf32>
    %2 = vector.shape_cast %1 : vector<8xf32> to vector<8x1xf32>
    %cst_1 = arith.constant 3.200000e+01 : f32
    %3 = vector.broadcast %cst_1 : f32 to vector<8x1xf32>
    %4 = arith.divf %2, %3 : vector<8x1xf32>
    %5 = vector.broadcast %4 : vector<8x1xf32> to vector<8x32xf32>
    %6 = arith.subf %0, %5 : vector<8x32xf32>
    %7 = arith.mulf %6, %6 : vector<8x32xf32>
    %cst_2 = arith.constant dense<0.000000e+00> : vector<8xf32>
    %8 = vector.multi_reduction <add>, %7, %cst_2 [1] : vector<8x32xf32> to vector<8xf32>
    %9 = vector.shape_cast %8 : vector<8xf32> to vector<8x1xf32>
    %cst_3 = arith.constant 3.200000e+01 : f32
    %10 = vector.broadcast %cst_3 : f32 to vector<8x1xf32>
    %11 = arith.divf %9, %10 : vector<8x1xf32>
    %cst_4 = arith.constant 9.99999974E-6 : f32
    %12 = vector.broadcast %cst_4 : f32 to vector<8x1xf32>
    %13 = arith.addf %11, %12 : vector<8x1xf32>
    %14 = math.rsqrt %13 : vector<8x1xf32>
    %15 = vector.broadcast %14 : vector<8x1xf32> to vector<8x32xf32>
    %16 = arith.mulf %6, %15 : vector<8x32xf32>
    %c0_5 = arith.constant 0 : index
    %c0_6 = arith.constant 0 : index
    %17 = vector.load %arg2[%c0_5, %c0_6] : memref<1x32xf32, #tpu.memory_space<vmem>>, vector<1x32xf32>
    %18 = vector.broadcast %17 : vector<1x32xf32> to vector<8x32xf32>
    %19 = arith.mulf %16, %18 : vector<8x32xf32>
    %c0_7 = arith.constant 0 : index
    %c0_8 = arith.constant 0 : index
    %20 = vector.load %arg3[%c0_7, %c0_8] : memref<1x32xf32, #tpu.memory_space<vmem>>, vector<1x32xf32>
    %21 = vector.broadcast %20 : vector<1x32xf32> to vector<8x32xf32>
    %22 = arith.addf %19, %21 : vector<8x32xf32>
    %c0_9 = arith.constant 0 : index
    %c0_10 = arith.constant 0 : index
    %23 = vector.load %arg4[%c0_9, %c0_10] : memref<32x128xf32, #tpu.memory_space<vmem>>, vector<32x128xf32>
    %cst_11 = arith.constant dense<0.000000e+00> : vector<8x128xf32>
    %24 = tpu.matmul %22, %23, %cst_11 {dimension_numbers = #tpu.dot_dimension_numbers<[1], [0], [0], [1], [0, 0, 1, 1], [], []>} : vector<8x32xf32>, vector<32x128xf32>, vector<8x128xf32> -> vector<8x128xf32>
    %c0_12 = arith.constant 0 : index
    %c0_13 = arith.constant 0 : index
    %25 = vector.load %arg5[%c0_12, %c0_13] : memref<1x128xf32, #tpu.memory_space<vmem>>, vector<1x128xf32>
    %26 = vector.broadcast %25 : vector<1x128xf32> to vector<8x128xf32>
    %27 = arith.addf %24, %26 : vector<8x128xf32>
    %cst_14 = arith.constant 0.000000e+00 : f32
    %28 = vector.broadcast %cst_14 : f32 to vector<8x128xf32>
    %29 = arith.maximumf %27, %28 : vector<8x128xf32>
    %c0_15 = arith.constant 0 : index
    %c0_16 = arith.constant 0 : index
    %30 = vector.load %arg6[%c0_15, %c0_16] : memref<128x32xf32, #tpu.memory_space<vmem>>, vector<128x32xf32>
    %cst_17 = arith.constant dense<0.000000e+00> : vector<8x32xf32>
    %31 = tpu.matmul %29, %30, %cst_17 {dimension_numbers = #tpu.dot_dimension_numbers<[1], [0], [0], [1], [0, 0, 1, 1], [], []>} : vector<8x128xf32>, vector<128x32xf32>, vector<8x32xf32> -> vector<8x32xf32>
    %c0_18 = arith.constant 0 : index
    %c0_19 = arith.constant 0 : index
    %32 = vector.load %arg7[%c0_18, %c0_19] : memref<1x32xf32, #tpu.memory_space<vmem>>, vector<1x32xf32>
    %33 = vector.broadcast %32 : vector<1x32xf32> to vector<8x32xf32>
    %34 = arith.addf %31, %33 : vector<8x32xf32>
    %c0_20 = arith.constant 0 : index
    %c0_21 = arith.constant 0 : index
    %35 = vector.load %arg1[%c0_20, %c0_21] : memref<8x32xf32, #tpu.memory_space<vmem>>, vector<8x32xf32>
    %36 = arith.addf %34, %35 : vector<8x32xf32>
    %c0_22 = arith.constant 0 : index
    %c0_23 = arith.constant 0 : index
    %37 = vector.load %arg8[%c0_22, %c0_23] : memref<8x32xf32, #tpu.memory_space<vmem>>, vector<8x32xf32>
    tpu.vector_store %arg8[%c0_22, %c0_23], %36 {strides = array<i32>} : memref<8x32xf32, #tpu.memory_space<vmem>>, vector<8x32xf32>,
    return
  }
  func.func @transform_0(%arg0: i32) -> (i32, i32) {
    %c0_i32 = arith.constant 0 : i32
    %c0_i32_0 = arith.constant 0 : i32
    return %arg0, %c0_i32 : i32, i32
  }
  func.func @transform_1(%arg0: i32) -> (i32, i32) {
    %c0_i32 = arith.constant 0 : i32
    %c0_i32_0 = arith.constant 0 : i32
    %c0_i32_1 = arith.constant 0 : i32
    return %c0_i32, %c0_i32_0 : i32, i32
  }
  func.func @transform_2(%arg0: i32) -> (i32, i32) {
    %c0_i32 = arith.constant 0 : i32
    %c0_i32_0 = arith.constant 0 : i32
    %c0_i32_1 = arith.constant 0 : i32
    return %c0_i32, %c0_i32_0 : i32, i32
  }
  func.func @transform_3(%arg0: i32) -> (i32, i32) {
    %c0_i32 = arith.constant 0 : i32
    %c0_i32_0 = arith.constant 0 : i32
    %c0_i32_1 = arith.constant 0 : i32
    return %c0_i32, %c0_i32_0 : i32, i32
  }
  func.func @transform_4(%arg0: i32) -> (i32, i32) {
    %c0_i32 = arith.constant 0 : i32
    %c0_i32_0 = arith.constant 0 : i32
    %c0_i32_1 = arith.constant 0 : i32
    return %c0_i32, %c0_i32_0 : i32, i32
  }
  func.func @transform_5(%arg0: i32) -> (i32, i32) {
    %c0_i32 = arith.constant 0 : i32
    %c0_i32_0 = arith.constant 0 : i32
    %c0_i32_1 = arith.constant 0 : i32
    return %c0_i32, %c0_i32_0 : i32, i32
  }
  func.func @transform_6(%arg0: i32) -> (i32, i32) {
    %c0_i32 = arith.constant 0 : i32
    %c0_i32_0 = arith.constant 0 : i32
    %c0_i32_1 = arith.constant 0 : i32
    return %c0_i32, %c0_i32_0 : i32, i32
  }
  func.func @transform_7(%arg0: i32) -> (i32, i32) {
    %c0_i32 = arith.constant 0 : i32
    %c0_i32_0 = arith.constant 0 : i32
    return %arg0, %c0_i32 : i32, i32
  }
}

</mosaic_0001>

<bundles_post_ra>
// kernel: tpu_custom_call.1
= control target key start
LH: loop header
LB: loop body
LE: loop exit
PB: predicated region body
PF: predicated region fallthrough
CT: control target
= control target key end

     0   :  { %12 = vsyncpa [#allocation3], 0  ;;  %s1005_s0 = inlined_call_operand.vmem [shape: f32[16,32], index: 0, kind: input, shape index: {}]   ;;  %s1006_s1 = inlined_call_operand.vmem [shape: f32[1,32], index: 1, kind: input, shape index: {}]   ;;  %s1007_s2 = inlined_call_operand.vmem [shape: f32[1,32], index: 2, kind: input, shape index: {}]   ;;  %s1008_s3 = inlined_call_operand.vmem [shape: f32[32,128], index: 3, kind: input, shape index: {}]   ;;  %s1009_s4 = inlined_call_operand.vmem [shape: f32[1,128], index: 4, kind: input, shape index: {}]   ;;  %s1010_s5 = inlined_call_operand.vmem [shape: f32[128,32], index: 5, kind: input, shape index: {}]   ;;  %s1011_s6 = inlined_call_operand.vmem [shape: f32[1,32], index: 6, kind: input, shape index: {}]   ;;  %s1012_s7 = inlined_call_operand.hbm [shape: f32[16,32], index: 7, kind: output, shape index: {}]  }
   0x1   :  { %14 = vsyncpa [#allocation3 + $0x1], 0  ;;  %s824_s24 = smov 0   ;;  %s826_s25 = smov 0  }
   0x2   :  { %s828_s26 = smov 0   ;;  %s830_s27 = smov 0  }
   0x3 LB: > { %s845_s28 = sadd.s32 4294967295, %s778_s27   ;;  %s559_s29 = sadd.s32 4294967294, %s778_s27   ;;  %s778_s27 = sphi %s830_s27, %s1018_s27   ;;  %s774_s26 = sphi %s828_s26, %s1017_s26   ;;  %s770_s25 = sphi %s826_s25, %s1016_s25   ;;  %s766_s24 = sphi %s824_s24, %s1015_s24  }
   0x4   : > { %s849_s30 = sadd.s32 1, %s778_s27   ;;  %s179_s8 = sadd.s32 1, %s774_s26 }
   0x5   : > { %s176_s9 = ssub.s32 %s778_s27, %s849_s30  ;;  %p189_p0 = scmp.ne.s32.totalorder %s774_s26, %s770_s25 }
   0x6   : > { %p177_p1 = scmp.eq.s32.totalorder %s176_s9, 0  ;;  %p190_p2 = scmp.eq.s32.totalorder %s845_s28, 1 }
   0x7   : > { %p195_p3 = scmp.ne.s32.totalorder %s770_s25, %s766_s24  ;;  %p196_p4 = scmp.eq.s32.totalorder %s559_s29, 1 }
   0x8   : > { %s860_s10 = scalar_select %p177_p1, %s774_s26, %s179_s8  }
   0x9   : > { %p862_p5 = por %p190_p2, %p189_p0  ;;  %p866_p6 = por %p196_p4, %p195_p3 }
   0xa   : > { %p562_p7 = scmp.ge.s32.totalorder %s778_s27, 1  ;;  %p239_p8 = scmp.lt.s32.totalorder %s778_s27, 3 }
   0xc   : > { %p240_p9 = pnand %p562_p7, %p239_p8 }
   0xd   : > { %p270_p10 = scmp.lt.s32.totalorder (!%p240_p9), %s845_s28, 1  ;;  %vm275_vm0 = vcmask (!%p240_p9), 261120   ;;  %v306_v7 = vld [vmem:[%s1008_s3] sm:$0xff] (!%p240_p9)  ;;  %v307_v8 = vld [vmem:[%s1008_s3 + $0x8] sm:$0xff] (!%p240_p9)  ;;  %v308_v9 = vld [vmem:[%s1008_s3 + $0x10] sm:$0xff] (!%p240_p9)  ;;  %v780_v10 = vmov (!%p240_p9), 0.0|0.0  }
   0xe   : > { %243 = sbr.rel (%p240_p9) target bundleno = 785 (0x311), region = 48  ;;  %642 = vmatprep.subr.bf16.mxu0 (!%p240_p9), %v780_v10  ;;  %v643_v11 = vpack.c.bf16 (!%p240_p9), %v307_v8, %v306_v7  ;;  %v309_v12 = vld [vmem:[%s1008_s3 + $0x18] sm:$0xff] (!%p240_p9)  ;;  %vm781_vm1 = vmmov (!%p240_p9), 0   ;;  %v782_v13 = vmov (!%p240_p9), 0.0   ;;  %648 = vmatprep.subr.bf16.mxu1 (!%p240_p9), %v780_v10  ;;  %v391_v15 = vld [vmem:[%s1010_s5] sm:$0xff] (!%p240_p9)  ;;  %v392_v16 = vld [vmem:[%s1010_s5 + $0x8] sm:$0xff] (!%p240_p9) }
   0xf   : > { %604 = vmatprep.mubr.msk.f32.mxu0 (!%p240_p9), %vm781_vm1, %v782_v13  ;;  %639 = vmatprep.mubr.msk.f32.mxu1 (!%p240_p9), %vm781_vm1, %v782_v13  ;;  %v646_v14 = vpack.c.bf16 (!%p240_p9), %v309_v12, %v308_v9  ;;  %v393_v17 = vld [vmem:[%s1010_s5 + $0x10] sm:$0xff] (!%p240_p9)  ;;  %v649_v18 = vpack.c.bf16 (!%p240_p9), %v392_v16, %v391_v15  ;;  %v394_v19 = vld [vmem:[%s1010_s5 + $0x18] sm:$0xff] (!%p240_p9)  ;;  %v395_v21 = vld [vmem:[%s1010_s5 + $0x20] sm:$0xff] (!%p240_p9)  ;;  %s267_s22 = sand.u32 (!%p240_p9), 1, %s770_s25   ;;  %s571_s9 = sshll.u32 (!%p240_p9), %s845_s28, 7 }
  0x10   : > { %644 = vmatpush3.bf16.msra.mxu0 (!%p240_p9), %v643_v11  ;;  %v652_v20 = vpack.c.bf16 (!%p240_p9), %v394_v19, %v393_v17  ;;  %v396_v22 = vld [vmem:[%s1010_s5 + $0x28] sm:$0xff] (!%p240_p9)  ;;  %v397_v24 = vld [vmem:[%s1010_s5 + $0x30] sm:$0xff] (!%p240_p9)  ;;  %v398_v25 = vld [vmem:[%s1010_s5 + $0x38] sm:$0xff] (!%p240_p9)  ;;  %s563_s23 = sshll.u32 (!%p240_p9), %s267_s22, 3  ;;  %s487_s18 = scalar_lea.sflag (!%p240_p9), [#allocation3], %s267_s22 }
  0x11   : > { %645 = vmatprep.subr.bf16.mxu0 (!%p240_p9), %v780_v10  ;;  %650 = vmatpush3.bf16.msra.mxu1 (!%p240_p9), %v649_v18  ;;  %v655_v23 = vpack.c.bf16 (!%p240_p9), %v396_v22, %v395_v21  ;;  %v658_v26 = vpack.c.bf16 (!%p240_p9), %v398_v25, %v397_v24  ;;  %v399_v27 = vld [vmem:[%s1010_s5 + $0x40] sm:$0xff] (!%p240_p9)  ;;  %v400_v28 = vld [vmem:[%s1010_s5 + $0x48] sm:$0xff] (!%p240_p9)  ;;  %v401_v30 = vld [vmem:[%s1010_s5 + $0x50] sm:$0xff] (!%p240_p9)  ;;  %s783_s19 = smov (!%p240_p9), [#allocation2]  }
  0x12   : > { %651 = vmatprep.subr.bf16.mxu1 (!%p240_p9), %v780_v10  ;;  %v661_v29 = vpack.c.bf16 (!%p240_p9), %v400_v28, %v399_v27  ;;  %v402_v31 = vld [vmem:[%s1010_s5 + $0x58] sm:$0xff] (!%p240_p9)  ;;  %v403_v33 = vld [vmem:[%s1010_s5 + $0x60] sm:$0xff] (!%p240_p9)  ;;  %v404_v34 = vld [vmem:[%s1010_s5 + $0x68] sm:$0xff] (!%p240_p9)  ;;  %s720_s20 = sshll.u32 (!%p240_p9), %s783_s19, 4  ;;  %s721_s20 = int_to_ptr.vmem [resolvable:$false] %s720_s20 }
  0x13   : > { %v664_v32 = vpack.c.bf16 (!%p240_p9), %v402_v31, %v401_v30  ;;  %v667_v35 = vpack.c.bf16 (!%p240_p9), %v404_v34, %v403_v33  ;;  %v565_v40 = vld [vmem:[%s1006_s1] ss:$0 sm:$0xff] (!%p240_p9)  ;;  %v405_v45 = vld [vmem:[%s1010_s5 + $0x70] sm:$0xff] (!%p240_p9)  ;;  %v406_v46 = vld [vmem:[%s1010_s5 + $0x78] sm:$0xff] (!%p240_p9)  ;;  %s722_s21 = scalar_lea.vmem (!%p240_p9), %s721_s20, 256 }
  0x14   : > { %647 = vmatpush3.bf16.msra.mxu0 (!%p240_p9), %v646_v14  ;;  %v566_v42 = vld [vmem:[%s1007_s2] ss:$0 sm:$0xff] (!%p240_p9)  ;;  %v670_v47 = vpack.c.bf16 (!%p240_p9), %v406_v46, %v405_v45 }
  0x15   : > { %s271_s13 = scalar_select %p270_p10, %s845_s28, 1  ;;  %653 = vmatpush3.bf16.msra.mxu1 %v652_v20  ;;  %v567_v48 = vld [vmem:[%s1009_s4] ss:$0 sm:$0xff] }
  0x16   : > { %654 = vmatprep.subr.bf16.mxu1 %v780_v10  ;;  %v569_v53 = vld [vmem:[%s1011_s6] ss:$0 sm:$0xff] }
  0x17   : > { %s564_s14 = sshll.u32 %s271_s13, 3  ;;  %s269_s13 = scalar_lea.vmem [#allocation2], %s563_s23 }
  0x18   : > { %s273_s17 = scalar_lea.vmem %s1005_s0, %s564_s14  ;;  %s500_s14 = sshll.u32 %s269_s13, 4  ;;  %s964_s14 = int_to_ptr.vmem [resolvable:$true] %s500_s14 }
  0x19   : > { %v877_v0 = vld [vmem:[%s273_s17] sm:$0xff]  ;;  %656 = vmatpush3.bf16.msra.mxu1 %v655_v23  ;;  %s962_s17 = scalar_lea.hbm %s1012_s7, %s571_s9  ;;  %s716_s28 = scalar_lea.vmem %s964_s14, 128 }
  0x1a   : > { %v276_v1 = vsel %vm275_vm0, %v877_v0, 0.0  ;;  %657 = vmatprep.subr.bf16.mxu1 %v780_v10  ;;  %p717_p11 = scmp.ne.s32.totalorder %s964_s14, %s716_s28  ;;  %p723_p0 = scmp.lt.s32.totalorder %s964_s14, %s721_s20 }
  0x1b   : > { %277 = vadd.xlane.f32.xlu0 %v276_v1  ;;  %p724_p1 = scmp.lt.s32.totalorder %s722_s21, %s716_s28 }
  0x1c   : > { %p718_p12 = pnand %p717_p11, %p862_p5 }
  0x1d   : > { %659 = vmatpush3.bf16.msra.mxu1 %v658_v26  ;;  %p725_p2 = por %p724_p1, %p723_p0 }
  0x1e   : > { %660 = vmatprep.subr.bf16.mxu1 %v780_v10  ;;  %p719_p13 = pneg %p718_p12 }
  0x20   : > { %p726_p3 = pnand %p725_p2, %p719_p13 }
  0x21   : > { %662 = vmatpush3.bf16.msra.mxu1 %v661_v29 }
  0x22   : > { %663 = vmatprep.subr.bf16.mxu1 %v780_v10 }
  0x25   : > { %665 = vmatpush3.bf16.msra.mxu1 %v664_v32 }
  0x26   : > { %666 = vmatprep.subr.bf16.mxu1 %v780_v10 }
  0x29   : > { %668 = vmatpush3.bf16.msra.mxu1 %v667_v35 }
  0x2a   : > { %669 = vmatprep.subr.bf16.mxu1 %v780_v10 }
  0x2d   : > { %671 = vmatpush3.bf16.msra.mxu1 %v670_v47 }
  0xa8   : > { %v278_v2 = vpop.xlane.xlu0 %277 }
  0xa9   : > { %v280_v3 = vmul.f32 0.03125, %v278_v2 }
  0xab   : > { %v281_v4 = vsub.f32 %v877_v0, %v280_v3 }
  0xad   : > { %v282_v5 = vmul.f32 %v281_v4, %v281_v4 }
  0xaf   : > { %v283_v6 = vsel %vm275_vm0, %v282_v5, 0.0 }
  0xb0   : > { %284 = vadd.xlane.f32.xlu0 %v283_v6 }
 0x13d   : > { %v285_v36 = vpop.xlane.xlu0 %284 }
 0x13e   : > { %v286_v37 = vmul.f32 0.03125, %v285_v36 }
 0x140   : > { %v287_v38 = vadd.f32 1e-05, %v286_v37 }
 0x142   : > { %714 = vrsqrt.f32 %v287_v38 }
 0x14c   : > { %v715_v39 = vpop.eup %714 }
 0x14d   : > { %v289_v41 = vmul.f32 %v715_v39, %v281_v4 }
 0x14f   : > { %v297_v43 = vmul.f32 %v565_v40, %v289_v41 }
 0x151   : > { %v305_v44 = vadd.f32 %v566_v42, %v297_v43 }
 0x153   : > { %605 = vmatmul.mubr.msk.f32.vlgmr.msra.gmra.mrb[0].mxu0 %vm275_vm0, %v305_v44 }
 0x226   : > { %v386_v49 = vpop.f32.mrb[0].mxu0 }
 0x227   : > { %v387_v50 = vadd.f32 %v567_v48, %v386_v49  ;;  %v606_v51 = vpop.f32.mrb[1].mxu0 }
 0x229   : > { %v390_v52 = vmax.f32 %v387_v50, 0.0 }
 0x22b   : > { %640 = vmatmul.mubr.f32.vlgmr.msra.gmra.mrb[0].mxu1 %v390_v52 }
 0x2fe   : > { %v480_v54 = vpop.f32.mrb[0].mxu1 }
 0x2ff   : > { %v481_v55 = vadd.f32 %v569_v53, %v480_v54  ;;  %v641_v56 = vpop.f32.mrb[1].mxu1 }
 0x301   : > { %v484_v57 = vadd.f32 %v481_v55, %v877_v0 }
 0x303   : > { %485 = vst.msk [vmem:[%s269_s13] sm:$0xff] %vm275_vm0, %v484_v57 }
 0x304   : > { %729 = shalt.err (!%p726_p3)
}
 0x305   : > { %s730_s22 = scalar_lea.hbm %s962_s17, 128  ;;  %s734_s8 = scalar_lea.hbm %s1012_s7, 256 }
 0x306   : > { %p731_p4 = scmp.ne.s32.totalorder %s962_s17, %s730_s22  ;;  %p735_p9 = scmp.lt.u32.totalorder %s962_s17, %s1012_s7 }
 0x307   : > { %p736_p10 = scmp.lt.u32.totalorder %s734_s8, %s730_s22  ;;  %p738_p12 = scmp.lt.u32.totalorder %s730_s22, %s962_s17 }
 0x308   : > { %p732_p7 = pnand %p731_p4, %p862_p5 }
 0x309   : > { %p737_p11 = por %p736_p10, %p735_p9 }
 0x30a   : > { %p733_p8 = pneg %p732_p7 }
 0x30b   : > { %p739_p13 = por %p738_p12, %p737_p11 }
 0x30d   : > { %p740_p0 = pnand %p739_p13, %p733_p8 }
 0x30f   : > { %743 = shalt.err (!%p740_p0)
}
 0x310   : > { %672 = dma.vmem_to_hbm [thread:$0]  (%p862_p5), %s964_s14, 128, %s962_s17, %s487_s18  }
 0x311 PF: > { %p678_p1 = scmp.ge.s32.totalorder %s778_s27, 2  ;;  %s512_s15 = sand.u32 1, %s766_s24  }
 0x312   : > { %s513_s16 = scalar_lea.sflag [#allocation3], %s512_s15 }
 0x313   : > { %p675_p2 = pnand %p678_p1, %p866_p6 }
 0x315   : > { %761 = dma.done.wait (!%p675_p2), %s513_s16, 128  }
 0x316   : > { %763 = vsyncadd (!%p675_p2), %s513_s16, 4294967168  ;;  %p17_p3 = scmp.ge.s32.totalorder %s849_s30, 4   ;;  %s1015_s24 = smov %s770_s25 }
 0x317   : > { %s1016_s25 = smov %s774_s26  ;;  %s1017_s26 = smov %s860_s10 }
 0x318   : > { %s1018_s27 = smov %s849_s30  ;;  %19 = sbr.rel (!%p17_p3) target bundleno = 3 (0x3), region = 83 }
 0x31f   :  { %518 = vsyncpa [#allocation3], 1 }
 0x320   :  { %520 = vsyncpa [#allocation3 + $0x1], 1 }

</bundles_post_ra>
